<compile_context>
chip_gen: v7x
topology: tpu7x:2x2x1
jax: 0.10.0
libtpu: 0.0.40
codegen_flags: <defaults>
</compile_context>

<pallas_src>
import functools

import jax
import jax.numpy as jnp
from jax.experimental import pallas as pl
from jax.experimental.pallas import tpu as pltpu


def _colbert_kernel(qh_ref, dh_ref, w_ref, dmask_ref, score_ref, *, bt, lq, ld):
    # qh_ref:    (Bt, Lq, H)  bf16
    # dh_ref:    (Bt, Ld, H)  bf16
    # w_ref:     (H, DIM)     bf16  -- constant index_map, VMEM-resident
    # dmask_ref: (Bt, 1, Ld)  f32   -- 1.0 = keep doc token, 0.0 = punct/pad
    # score_ref: (Bt, 1, 128) f32   -- lane-dense output (lane 0 used)
    w = w_ref[...]
    h, dim = w.shape

    # Tall-M projection matmuls on the MXU (bf16 inputs, f32 accumulation).
    # Leading-dim merges are layout-free (Lq/Ld are multiples of the sublane
    # pack), so these reshapes cost nothing.
    qp = jnp.dot(qh_ref[...].reshape(bt * lq, h), w,
                 preferred_element_type=jnp.float32)              # (Bt*Lq, DIM)
    dp = jnp.dot(dh_ref[...].reshape(bt * ld, h), w,
                 preferred_element_type=jnp.float32)              # (Bt*Ld, DIM)
    qp3 = qp.reshape(bt, lq, dim)
    dp3 = dp.reshape(bt, ld, dim)

    # torch.nn.functional.normalize(p=2, dim=-1): x / max(||x||, eps),
    # folded into post-matmul scaling. rsqrt(max(sumsq, eps^2)) runs on the
    # EUP slot; all elementwise math stays f32 (v5e-friendly).
    eps2 = jnp.float32(1e-24)                                      # (1e-12)^2
    q_rs = jax.lax.rsqrt(jnp.maximum(jnp.sum(qp3 * qp3, axis=-1), eps2))  # (Bt, Lq)
    d_rs = jax.lax.rsqrt(jnp.maximum(jnp.sum(dp3 * dp3, axis=-1), eps2))  # (Bt, Ld)

    # Batched cosine-similarity matmul on the MXU (raw projections in bf16;
    # normalization applied as scales below).
    sim = jnp.einsum('bqd,bkd->bqk',
                     qp3.astype(jnp.bfloat16), dp3.astype(jnp.bfloat16),
                     preferred_element_type=jnp.float32)           # (Bt, Lq, Ld)

    # Column scale: doc mask (numerically identical to the reference's
    # `D = D * mask` before normalize) fused with the doc-side 1/||d||.
    sim = sim * (dmask_ref[...] * d_rs[:, None, :])                # (Bt, 1, Ld)

    # Row scale: query-side 1/||q|| commutes with the max (positive scalar).
    max_sim = jnp.max(sim, axis=-1) * q_rs                         # (Bt, Lq)
    score = jnp.sum(max_sim, axis=-1, keepdims=True)               # (Bt, 1)
    # Lane-dense store (avoids a masked 1-lane vst each step).
    score_ref[...] = jnp.broadcast_to(score[:, :, None], score_ref.shape)


def _pick_block_batch(batch, requested):
    """Largest divisor of `batch` <= requested, keeping >= 2 grid steps when
    possible so v7x's two TensorCores both get work."""
    bt = max(1, min(requested, batch))
    while batch % bt != 0:
        bt -= 1
    if batch // bt < 2:
        for cand in range(bt - 1, 0, -1):
            if batch % cand == 0 and batch // cand >= 2:
                return cand
    return bt


def colbert_score(q_hidden, d_hidden, w, d_mask, *, block_batch=8):
    """MaxSim scores.

    q_hidden: (B, Lq, H)  encoder last_hidden_state for queries (ideally bf16)
    d_hidden: (B, Ld, H)  encoder last_hidden_state for docs    (ideally bf16)
    w:        (H, DIM)    nn.Linear(H, DIM, bias=False) weight, transposed
    d_mask:   (B, Ld)     1.0 = keep doc token (not punctuation, not pad)
    returns:  (B,) f32
    """
    B, Lq, H = q_hidden.shape
    _, Ld, _ = d_hidden.shape
    DIM = w.shape[1]

    # No wrapper-side concat/materialization: the two hidden-state tensors go
    # straight into the kernel. Cast only if the caller didn't already keep
    # them in bf16 upstream (the encoder should emit bf16 to avoid this pass).
    qh = q_hidden if q_hidden.dtype == jnp.bfloat16 else q_hidden.astype(jnp.bfloat16)
    dh = d_hidden if d_hidden.dtype == jnp.bfloat16 else d_hidden.astype(jnp.bfloat16)
    w_bf16 = w.astype(jnp.bfloat16)
    d_mask3 = d_mask.reshape(B, 1, Ld).astype(jnp.float32)

    # VMEM budget @ real sizes (Lq=Ld=128, H=768, DIM=128, Bt=8): q+d blocks
    # ~3 MiB/step (double-buffered ~6 MiB) + W 192 KiB + f32 proj/sim scratch
    # ~1.5 MiB -> comfortably under the 32 MiB scoped default on every
    # generation including v7x, with no vmem_limit_bytes bump.
    bt = _pick_block_batch(B, block_batch)

    flops = 2 * B * (Lq + Ld) * H * DIM + 2 * B * Lq * Ld * DIM
    bytes_accessed = (B * (Lq + Ld) * H * 2 + H * DIM * 2
                      + B * Ld * 4 + B * 128 * 4)

    kernel = functools.partial(_colbert_kernel, bt=bt, lq=Lq, ld=Ld)
    out = pl.pallas_call(
        kernel,
        out_shape=jax.ShapeDtypeStruct((B, 1, 128), jnp.float32),
        grid=(B // bt,),
        in_specs=[
            pl.BlockSpec((bt, Lq, H), lambda b: (b, 0, 0)),
            pl.BlockSpec((bt, Ld, H), lambda b: (b, 0, 0)),
            pl.BlockSpec((H, DIM), lambda b: (0, 0)),       # resident across steps
            pl.BlockSpec((bt, 1, Ld), lambda b: (b, 0, 0)),
        ],
        out_specs=pl.BlockSpec((bt, 1, 128), lambda b: (b, 0, 0)),
        compiler_params=pltpu.CompilerParams(
            dimension_semantics=("parallel",)),
        cost_estimate=pl.CostEstimate(
            flops=flops, transcendentals=B * (Lq + Ld),
            bytes_accessed=bytes_accessed),
    )(qh, dh, w_bf16, d_mask3)
    return out[:, 0, 0]                                      # (B,) scores


if __name__ == "__main__":
    # Small shapes consistent with the module (dim=128 matches the default).
    B, Lq, Ld, H, DIM, VOCAB = 4, 16, 16, 64, 128, 64

    key = jax.random.PRNGKey(0)
    k_emb, k_w, k_q, k_d = jax.random.split(key, 4)

    # deterministic synthetic "parameters"
    embed_table = jax.random.normal(k_emb, (VOCAB, H), dtype=jnp.float32) * 0.02
    # nn.Linear(hidden, dim, bias=False) weight, stored transposed: (H, DIM)
    w = jax.random.normal(k_w, (H, DIM), dtype=jnp.float32) * 0.02

    # synthetic token ids (0 = pad); fixed "punctuation" token ids
    punct_ids = jnp.array([3, 5, 7], dtype=jnp.int32)
    query_input_ids = jax.random.randint(k_q, (B, Lq), 1, VOCAB, dtype=jnp.int32)
    doc_input_ids = jax.random.randint(k_d, (B, Ld), 0, VOCAB, dtype=jnp.int32)
    # attention masks are only consumed by the BERT encoder (see TODO below)
    query_attention_mask = jnp.ones((B, Lq), jnp.int32)
    doc_attention_mask = (doc_input_ids != 0).astype(jnp.int32)

    # TODO(synk): the full BertModel encoder has no clean single-kernel Pallas
    # equivalent here; its last_hidden_state is stood in for by a deterministic
    # embedding lookup (glue JAX), produced directly in bf16 so the scoring
    # kernel needs no wrapper-side materialization pass. Everything downstream
    # of the encoder (linear projection, punctuation mask, L2-normalize,
    # cosine MaxSim) runs inside the Pallas kernel, matching the module.
    q_hidden = embed_table[query_input_ids].astype(jnp.bfloat16)   # (B, Lq, H)
    d_hidden = embed_table[doc_input_ids].astype(jnp.bfloat16)     # (B, Ld, H)

    # ColBERT.mask(): token not in punctuation skiplist and not pad (id != 0)
    is_punct = (doc_input_ids[..., None] == punct_ids[None, None, :]).any(-1)
    d_mask = ((doc_input_ids != 0) & (~is_punct)).astype(jnp.float32)  # (B, Ld)

    scores = colbert_score(q_hidden, d_hidden, w, d_mask)
    jax.block_until_ready(scores)
    assert scores.shape == (B,)

    # Pure-JAX f32 reference with the original module's op order.
    def ref(qh, dh, w_, mask):
        q = qh.astype(jnp.float32) @ w_
        d = dh.astype(jnp.float32) @ w_
        d = d * mask[..., None]
        q = q / jnp.maximum(jnp.linalg.norm(q, axis=-1, keepdims=True), 1e-12)
        d = d / jnp.maximum(jnp.linalg.norm(d, axis=-1, keepdims=True), 1e-12)
        sim = jnp.einsum('bqd,bkd->bqk', q, d)
        return jnp.sum(jnp.max(sim, axis=-1), axis=-1)

    expected = ref(q_hidden, d_hidden, w, d_mask)
    err = float(jnp.max(jnp.abs(scores - expected)))
    # bf16 MXU inputs vs f32 reference -> loose tolerance (ranking-safe)
    assert err < 0.3, f"max abs err {err}"
    print("KERNEL_OK")
</pallas_src>

<mosaic_0001>
module attributes {stable_mosaic.version = 11 : i64} {
  func.func @_colbert_kernel(%arg0: i32, %arg1: memref<2x16x64xbf16, #tpu.memory_space<vmem>>, %arg2: memref<2x16x64xbf16, #tpu.memory_space<vmem>>, %arg3: memref<64x128xbf16, #tpu.memory_space<vmem>>, %arg4: memref<2x1x16xf32, #tpu.memory_space<vmem>>, %arg5: memref<2x1x128xf32, #tpu.memory_space<vmem>>) attributes {dimension_semantics = [#tpu.dimension_semantics<parallel>], iteration_bounds = array<i64: 2>, scalar_prefetch = 0 : i64, scratch_operands = 0 : i64, tpu.core_type = #tpu.core_type<tc>, window_params = [{transform_indices = @transform_0, window_bounds = array<i64: 2, 16, 64>}, {transform_indices = @transform_1, window_bounds = array<i64: 2, 16, 64>}, {pipeline_mode = #tpu.pipeline_mode<synchronous>, transform_indices = @transform_2, window_bounds = array<i64: 64, 128>}, {transform_indices = @transform_3, window_bounds = array<i64: 2, 1, 16>}, {transform_indices = @transform_4, window_bounds = array<i64: 2, 1, 128>}]} {
    %c0 = arith.constant 0 : index
    %c0_0 = arith.constant 0 : index
    %0 = vector.load %arg3[%c0, %c0_0] : memref<64x128xbf16, #tpu.memory_space<vmem>>, vector<64x128xbf16>
    %c0_1 = arith.constant 0 : index
    %c0_2 = arith.constant 0 : index
    %c0_3 = arith.constant 0 : index
    %1 = vector.load %arg1[%c0_1, %c0_2, %c0_3] : memref<2x16x64xbf16, #tpu.memory_space<vmem>>, vector<2x16x64xbf16>
    %2 = vector.shape_cast %1 : vector<2x16x64xbf16> to vector<32x64xbf16>
    %cst = arith.constant dense<0.000000e+00> : vector<32x128xf32>
    %3 = tpu.matmul %2, %0, %cst {dimension_numbers = #tpu.dot_dimension_numbers<[1], [0], [0], [1], [0, 0, 1, 1], [], []>} : vector<32x64xbf16>, vector<64x128xbf16>, vector<32x128xf32> -> vector<32x128xf32>
    %c0_4 = arith.constant 0 : index
    %c0_5 = arith.constant 0 : index
    %c0_6 = arith.constant 0 : index
    %4 = vector.load %arg2[%c0_4, %c0_5, %c0_6] : memref<2x16x64xbf16, #tpu.memory_space<vmem>>, vector<2x16x64xbf16>
    %5 = vector.shape_cast %4 : vector<2x16x64xbf16> to vector<32x64xbf16>
    %cst_7 = arith.constant dense<0.000000e+00> : vector<32x128xf32>
    %6 = tpu.matmul %5, %0, %cst_7 {dimension_numbers = #tpu.dot_dimension_numbers<[1], [0], [0], [1], [0, 0, 1, 1], [], []>} : vector<32x64xbf16>, vector<64x128xbf16>, vector<32x128xf32> -> vector<32x128xf32>
    %7 = vector.shape_cast %3 : vector<32x128xf32> to vector<2x16x128xf32>
    %8 = vector.shape_cast %6 : vector<32x128xf32> to vector<2x16x128xf32>
    %9 = arith.mulf %7, %7 : vector<2x16x128xf32>
    %cst_8 = arith.constant dense<0.000000e+00> : vector<2x16xf32>
    %10 = vector.multi_reduction <add>, %9, %cst_8 [2] : vector<2x16x128xf32> to vector<2x16xf32>
    %cst_9 = arith.constant 1.000000e-24 : f32
    %11 = vector.broadcast %cst_9 : f32 to vector<2x16xf32>
    %12 = arith.maximumf %10, %11 : vector<2x16xf32>
    %13 = math.rsqrt %12 : vector<2x16xf32>
    %14 = arith.mulf %8, %8 : vector<2x16x128xf32>
    %cst_10 = arith.constant dense<0.000000e+00> : vector<2x16xf32>
    %15 = vector.multi_reduction <add>, %14, %cst_10 [2] : vector<2x16x128xf32> to vector<2x16xf32>
    %cst_11 = arith.constant 1.000000e-24 : f32
    %16 = vector.broadcast %cst_11 : f32 to vector<2x16xf32>
    %17 = arith.maximumf %15, %16 : vector<2x16xf32>
    %18 = math.rsqrt %17 : vector<2x16xf32>
    %19 = arith.truncf %7 : vector<2x16x128xf32> to vector<2x16x128xbf16>
    %20 = arith.truncf %8 : vector<2x16x128xf32> to vector<2x16x128xbf16>
    "tpu.trace_start"() <{level = 10 : i32, message = "bqd,bkd->bqk"}> : () -> ()
    %cst_12 = arith.constant dense<0.000000e+00> : vector<2x16x16xf32>
    %21 = tpu.matmul %19, %20, %cst_12 {dimension_numbers = #tpu.dot_dimension_numbers<[2], [2], [1], [1], [0, 0, 0, 1, 1, 1], [0], [0]>} : vector<2x16x128xbf16>, vector<2x16x128xbf16>, vector<2x16x16xf32> -> vector<2x16x16xf32>
    "tpu.trace_stop"() : () -> ()
    %c0_13 = arith.constant 0 : index
    %c0_14 = arith.constant 0 : index
    %c0_15 = arith.constant 0 : index
    %22 = vector.load %arg4[%c0_13, %c0_14, %c0_15] : memref<2x1x16xf32, #tpu.memory_space<vmem>>, vector<2x1x16xf32>
    %23 = vector.shape_cast %18 : vector<2x16xf32> to vector<2x1x16xf32>
    %24 = arith.mulf %22, %23 : vector<2x1x16xf32>
    %25 = vector.broadcast %24 : vector<2x1x16xf32> to vector<2x16x16xf32>
    %26 = arith.mulf %21, %25 : vector<2x16x16xf32>
    %cst_16 = arith.constant dense<0xFF800000> : vector<2x16xf32>
    %27 = vector.multi_reduction <maximumf>, %26, %cst_16 [2] : vector<2x16x16xf32> to vector<2x16xf32>
    %28 = arith.mulf %27, %13 : vector<2x16xf32>
    %cst_17 = arith.constant dense<0.000000e+00> : vector<2xf32>
    %29 = vector.multi_reduction <add>, %28, %cst_17 [1] : vector<2x16xf32> to vector<2xf32>
    %30 = vector.shape_cast %29 : vector<2xf32> to vector<2x1xf32>
    %31 = vector.shape_cast %30 : vector<2x1xf32> to vector<2x1x1xf32>
    %32 = vector.shape_cast %31 : vector<2x1x1xf32> to vector<2x1x1xf32>
    %33 = vector.broadcast %32 : vector<2x1x1xf32> to vector<2x1x128xf32>
    %c0_18 = arith.constant 0 : index
    %c0_19 = arith.constant 0 : index
    %c0_20 = arith.constant 0 : index
    %34 = vector.load %arg5[%c0_18, %c0_19, %c0_20] : memref<2x1x128xf32, #tpu.memory_space<vmem>>, vector<2x1x128xf32>
    tpu.vector_store %arg5[%c0_18, %c0_19, %c0_20], %33 {strides = array<i32>} : memref<2x1x128xf32, #tpu.memory_space<vmem>>, vector<2x1x128xf32>,
    return
  }
  func.func @transform_0(%arg0: i32) -> (i32, i32, i32) {
    %c0_i32 = arith.constant 0 : i32
    %c0_i32_0 = arith.constant 0 : i32
    %c0_i32_1 = arith.constant 0 : i32
    return %arg0, %c0_i32, %c0_i32_0 : i32, i32, i32
  }
  func.func @transform_1(%arg0: i32) -> (i32, i32, i32) {
    %c0_i32 = arith.constant 0 : i32
    %c0_i32_0 = arith.constant 0 : i32
    %c0_i32_1 = arith.constant 0 : i32
    return %arg0, %c0_i32, %c0_i32_0 : i32, i32, i32
  }
  func.func @transform_2(%arg0: i32) -> (i32, i32) {
    %c0_i32 = arith.constant 0 : i32
    %c0_i32_0 = arith.constant 0 : i32
    %c0_i32_1 = arith.constant 0 : i32
    return %c0_i32, %c0_i32_0 : i32, i32
  }
  func.func @transform_3(%arg0: i32) -> (i32, i32, i32) {
    %c0_i32 = arith.constant 0 : i32
    %c0_i32_0 = arith.constant 0 : i32
    %c0_i32_1 = arith.constant 0 : i32
    return %arg0, %c0_i32, %c0_i32_0 : i32, i32, i32
  }
  func.func @transform_4(%arg0: i32) -> (i32, i32, i32) {
    %c0_i32 = arith.constant 0 : i32
    %c0_i32_0 = arith.constant 0 : i32
    %c0_i32_1 = arith.constant 0 : i32
    return %arg0, %c0_i32, %c0_i32_0 : i32, i32, i32
  }
}

</mosaic_0001>

<bundles_post_ra>
// kernel: tpu_custom_call.1
= control target key start
LH: loop header
LB: loop body
LE: loop exit
PB: predicated region body
PF: predicated region fallthrough
CT: control target
= control target key end

     0   :  { %s1979_s0 = inlined_call_operand.hbm [shape: bf16[4,16,64], index: 0, kind: input, shape index: {}]   ;;  %s1980_s1 = inlined_call_operand.hbm [shape: bf16[4,16,64], index: 1, kind: input, shape index: {}]   ;;  %s1981_s2 = inlined_call_operand.hbm [shape: bf16[64,128], index: 2, kind: input, shape index: {}]   ;;  %s1982_s3 = inlined_call_operand.vmem [shape: f32[4,1,16], index: 3, kind: input, shape index: {}]   ;;  %s1983_s4 = inlined_call_operand.hbm [shape: f32[4,1,128], index: 4, kind: output, shape index: {}]  }
   0x1   :  { %1991 = sst [smem:[#allocation14_spill]] %s1979_s0 }
   0x2   :  { %1992 = sst [smem:[#allocation15_spill]] %s1981_s2 }
   0x3   :  { %9 = vsyncpa [#allocation3], 0 }
   0x4   :  { %11 = vsyncpa [#allocation3 + $0x1], 0 }
   0x5   :  { %12 = vsyncpa [#allocation6], 0 }
   0x6   :  { %14 = vsyncpa [#allocation6 + $0x1], 0 }
   0x7   :  { %15 = vsyncpa [#allocation4], 0 }
   0x8   :  { %17 = vsyncpa [#allocation4 + $0x1], 0  ;;  %s1580_s15 = smov 0   ;;  %s1582_s16 = smov 0  }
   0x9   :  { %s1584_s17 = smov 0   ;;  %s1586_s18 = smov 0  }
   0xa LB: > { %s1601_s19 = sadd.s32 4294967295, %s1541_s18   ;;  %s1191_s20 = sadd.s32 4294967294, %s1541_s18   ;;  %s1541_s18 = sphi %s1586_s18, %s2015_s18   ;;  %s1537_s17 = sphi %s1584_s17, %s2014_s17   ;;  %s1533_s16 = sphi %s1582_s16, %s2013_s16   ;;  %s1529_s15 = sphi %s1580_s15, %s2012_s15  }
   0xb   : > { %p43_p0 = scmp.ne.s32.totalorder %s1533_s16, %s1529_s15  ;;  %p1984_p1 = scmp.eq.s32.totalorder %s1601_s19, 0 }
   0xc   : > { %p146_p3 = scmp.eq.s32.totalorder %s1191_s20, 1  ;;  %p1192_p5 = scmp.ge.s32.totalorder %s1541_s18, 1 }
   0xd   : > { %p1610_p4 = por %p1984_p1, %p43_p0  ;;  %p153_p7 = scmp.lt.s32.totalorder %s1541_s18, 3 }
   0xe   : > { %p1615_p6 = por %p146_p3, %p43_p0  ;;  %s1543_s24 = smov [#allocation7]  }
   0xf   : > { %s1993_s21 = scalar_select %p1610_p4, 1, 0 }
  0x10   : > { %s1994_s22 = scalar_select %p1615_p6, 1, 0 }
  0x11   : > { %p1620_p8 = pnand %p1192_p5, %p153_p7  ;;  %s165_s25 = sshll.u32 %s1543_s24, 4  ;;  %s1624_s25 = int_to_ptr.vmem [resolvable:$true] %s165_s25 }
  0x12   : > { %s1636_s27 = sadd.s32 1, %s1541_s18   ;;  %s30_s28 = sadd.s32 1, %s1537_s17 }
  0x13   : > { %s1995_s23 = scalar_select %p1620_p8, 1, 0 }
  0x14   : > { %p1293_p9 = pneg %p1620_p8  ;;  %s27_s29 = ssub.s32 %s1541_s18, %s1636_s27 }
  0x15   : > { %s1997_s2 = sld [smem:[#allocation15_spill]] }
  0x16   : > { %p1631_p11 = pnand %p1293_p9, %p1984_p1 }
  0x18   : > { %p1381_p13 = pneg %p1631_p11 }
  0x1b   : > { %s1379_s6 = scalar_lea.hbm %s1997_s2, 512 }
  0x1c   : > { %p1380_p12 = scmp.ne.s32.totalorder %s1997_s2, %s1379_s6  ;;  %p1386_p5 = scmp.lt.u32.totalorder %s1379_s6, %s1997_s2 }
  0x1e   : > { %p1382_p0 = pnand %p1381_p13, %p1380_p12 }
  0x20   : > { %p1383_p3 = pneg %p1382_p0 }
  0x22   : > { %p1388_p7 = pnand %p1386_p5, %p1383_p3 }
  0x24   : > { %1391 = shalt.err (!%p1388_p7)
}
  0x25   : > { %s1392_s11 = scalar_lea.vmem %s1624_s25, 512  ;;  %p1400_p2 = scmp.lt.s32.totalorder %s1624_s25, %s1624_s25 }
  0x26   : > { %p1393_p9 = scmp.ne.s32.totalorder %s1624_s25, %s1392_s11  ;;  %p1401_p6 = scmp.lt.s32.totalorder %s1392_s11, %s1392_s11 }
  0x28   : > { %p1395_p10 = pnand %p1393_p9, %p1381_p13  ;;  %p1402_p4 = por %p1401_p6, %p1400_p2 }
  0x2a   : > { %p1396_p1 = pneg %p1395_p10 }
  0x2c   : > { %p1403_p8 = pnand %p1402_p4, %p1396_p1 }
  0x2e   : > { %1406 = shalt.err (!%p1403_p8)
}
  0x2f   : > { %s1987_s12 = smov 64   ;;  %s1989_s13 = smov 4  }
  0x30   : > { %1296 = dma.hbm_to_vmem [thread:$0]  (!%p1631_p11), %s1997_s2, 512, %s1624_s25, [#allocation6], %s1987_s12, %s1987_s12, %s1989_s13  }
  0x31   : > { %p28_p1 = scmp.eq.s32.totalorder %s27_s29, 0  ;;  %p37_p2 = scmp.ne.s32.totalorder %s1537_s17, %s1533_s16 }
  0x32   : > { %p38_p4 = scmp.eq.s32.totalorder %s1541_s18, 0  ;;  %p1309_p6 = scmp.lt.s32.totalorder %s1541_s18, 2 }
  0x33   : > { %s1670_s24 = scalar_select %p28_p1, %s1537_s17, %s30_s28  }
  0x34   : > { %p39_p8 = por %p38_p4, %p37_p2  ;;  %p1999_p10 = scmp.eq.s32.totalorder %s1601_s19, 1 }
  0x35   : > { %1998 = sst [smem:[#allocation13_spill]] %s1670_s24  ;;  %s179_s26 = sand.u32 1, %s1537_s17  }
  0x36   : > { %p1674_p12 = por %p1999_p10, %p37_p2  ;;  %s1227_s5 = sshll.u32 %s1541_s18, 8 }
  0x37   : > { %s1680_s6 = sshll.u32 %s179_s26, 4  ;;  %s2001_s0 = sld [smem:[#allocation14_spill]] }
  0x38   : > { %s183_s28 = scalar_lea.vmem [#allocation2], %s1680_s6  ;;  %p1688_p11 = pnand %p1309_p6, %p39_p8 }
  0x39   : > { %s191_s29 = sshll.u32 %s183_s28, 4  ;;  %s1697_s14 = scalar_lea.hbm %s1980_s1, %s1227_s5  ;;  %s1692_s29 = int_to_ptr.vmem [resolvable:$true] %s191_s29 }
  0x3a   : > { %s1699_s20 = scalar_lea.sflag [#allocation3], %s179_s26  ;;  %p1409_p0 = pneg %p1688_p11 }
  0x3d   : > { %s1685_s25 = scalar_lea.hbm %s2001_s0, %s1227_s5  ;;  %s1412_s12 = scalar_lea.hbm %s2001_s0, 512 }
  0x3e   : > { %s1407_s7 = scalar_lea.hbm %s1685_s25, 256  ;;  %p1413_p7 = scmp.lt.u32.totalorder %s1685_s25, %s2001_s0 }
  0x3f   : > { %p1408_p13 = scmp.ne.s32.totalorder %s1685_s25, %s1407_s7  ;;  %p1414_p9 = scmp.lt.u32.totalorder %s1412_s12, %s1407_s7 }
  0x40   : > { %p1416_p2 = scmp.lt.u32.totalorder %s1407_s7, %s1685_s25 }
  0x41   : > { %p1410_p3 = pnand %p1409_p0, %p1408_p13  ;;  %p1415_p1 = por %p1414_p9, %p1413_p7 }
  0x43   : > { %p1411_p5 = pneg %p1410_p3  ;;  %p1417_p4 = por %p1416_p2, %p1415_p1 }
  0x45   : > { %p1418_p6 = pnand %p1417_p4, %p1411_p5 }
  0x47   : > { %1421 = shalt.err (!%p1418_p6)
}
  0x48   : > { %s1422_s26 = scalar_lea.vmem %s1692_s29, 256  ;;  %s1546_s5 = smov [#allocation2]  }
  0x49   : > { %p1423_p8 = scmp.ne.s32.totalorder %s1692_s29, %s1422_s26  ;;  %s1427_s10 = sshll.u32 %s1546_s5, 4  ;;  %s1428_s10 = int_to_ptr.vmem [resolvable:$false] %s1427_s10 }
  0x4a   : > { %s1429_s2 = scalar_lea.vmem %s1428_s10, 512  ;;  %p1430_p3 = scmp.lt.s32.totalorder %s1692_s29, %s1428_s10 }
  0x4b   : > { %p1425_p10 = pnand %p1423_p8, %p1409_p0  ;;  %p1431_p7 = scmp.lt.s32.totalorder %s1429_s2, %s1422_s26 }
  0x4d   : > { %p1426_p13 = pneg %p1425_p10  ;;  %p1432_p9 = por %p1431_p7, %p1430_p3 }
  0x4f   : > { %p1433_p1 = pnand %p1432_p9, %p1426_p13 }
  0x51   : > { %1436 = shalt.err (!%p1433_p1)
}
  0x52   : > { %s2003_s12 = smov 4   ;;  %s2004_s13 = smov 64  }
  0x53   : > { %1300 = dma.hbm_to_vmem [thread:$0]  (!%p1688_p11), %s1685_s25, 256, %s1692_s29, %s1699_s20, %s2004_s13, %s2004_s13, %s2003_s12  }
  0x54   : > { %s205_s11 = scalar_lea.vmem [#allocation5], %s1680_s6  ;;  %s201_s8 = sand.u32 1, %s1541_s18  }
  0x55   : > { %s213_s7 = sshll.u32 %s205_s11, 4  ;;  %s1734_s28 = scalar_lea.sflag [#allocation6], %s201_s8  ;;  %s1732_s7 = int_to_ptr.vmem [resolvable:$true] %s213_s7 }
  0x56   : > { %s1437_s26 = scalar_lea.hbm %s1697_s14, 256  ;;  %s1442_s2 = scalar_lea.hbm %s1980_s1, 512 }
  0x57   : > { %p1438_p5 = scmp.ne.s32.totalorder %s1697_s14, %s1437_s26  ;;  %p1443_p6 = scmp.lt.u32.totalorder %s1697_s14, %s1980_s1 }
  0x58   : > { %p1444_p8 = scmp.lt.u32.totalorder %s1442_s2, %s1437_s26  ;;  %p1446_p13 = scmp.lt.u32.totalorder %s1437_s26, %s1697_s14 }
  0x59   : > { %p1440_p2 = pnand %p1438_p5, %p1409_p0 }
  0x5a   : > { %p1445_p10 = por %p1444_p8, %p1443_p6 }
  0x5b   : > { %p1441_p4 = pneg %p1440_p2 }
  0x5c   : > { %p1447_p3 = por %p1446_p13, %p1445_p10 }
  0x5e   : > { %p1448_p7 = pnand %p1447_p3, %p1441_p4 }
  0x60   : > { %1451 = shalt.err (!%p1448_p7)
}
  0x61   : > { %s1452_s6 = scalar_lea.vmem %s1732_s7, 256  ;;  %s1547_s25 = smov [#allocation5]  }
  0x62   : > { %p1453_p9 = scmp.ne.s32.totalorder %s1732_s7, %s1452_s6  ;;  %s1457_s29 = sshll.u32 %s1547_s25, 4  ;;  %s1458_s29 = int_to_ptr.vmem [resolvable:$false] %s1457_s29 }
  0x63   : > { %s1459_s0 = scalar_lea.vmem %s1458_s29, 512  ;;  %p1460_p2 = scmp.lt.s32.totalorder %s1732_s7, %s1458_s29 }
  0x64   : > { %p1455_p1 = pnand %p1453_p9, %p1409_p0  ;;  %p1461_p6 = scmp.lt.s32.totalorder %s1459_s0, %s1452_s6 }
  0x66   : > { %p1456_p5 = pneg %p1455_p1  ;;  %p1462_p8 = por %p1461_p6, %p1460_p2 }
  0x68   : > { %p1463_p10 = pnand %p1462_p8, %p1456_p5 }
  0x6a   : > { %1466 = shalt.err (!%p1463_p10)
}
  0x6b   : > { %1303 = dma.hbm_to_vmem [thread:$0]  (!%p1688_p11), %s1697_s14, 256, %s1732_s7, %s1734_s28, %s2004_s13, %s2004_s13, %s2003_s12  }
  0x6c   : > { %p2005_p0 = scmp.ne.s32.totalorder %s1995_s23, 0 }
  0x6d   : > { %s1766_s24 = sand.u32 (!%p2005_p0), 1, %s1533_s16   ;;  %p2006_p4 = scmp.ne.s32.totalorder (!%p2005_p0), %s1993_s21, 0 }
  0x6e   : > { %233 = sbr.rel (%p2005_p0) target bundleno = 991 (0x3df), region = 36  ;;  %s1204_s20 = sshll.u32 (!%p2005_p0), %s1766_s24, 4 }
  0x6f   : > { %s236_s11 = scalar_lea.sflag (!%p2005_p0), [#allocation3], %s1766_s24  ;;  %s1770_s8 = scalar_lea.vmem (!%p2005_p0), [#allocation2], %s1204_s20 }
  0x75   : > { %1512 = dma.done.wait (%p2006_p4), %s236_s11, 256  }
  0x76   : > { %1514 = vsyncadd (%p2006_p4), %s236_s11, 4294967040  ;;  %s244_s9 = sand.u32 1, %s1601_s19   ;;  %s248_s14 = scalar_lea.vmem [#allocation5], %s1204_s20 }
  0x77   : > { %s245_s23 = scalar_lea.sflag [#allocation6], %s244_s9 }
  0x78   : > { %1516 = dma.done.wait (%p2006_p4), %s245_s23, 256  }
  0x79   : > { %1518 = vsyncadd (%p2006_p4), %s245_s23, 4294967040  ;;  %p2007_p11 = scmp.eq.s32.totalorder %s1601_s19, 0 }
  0x7b   : > { %1520 = dma.done.wait (%p2007_p11), [#allocation6], 512   ;;  %p2008_p13 = pmov %p2007_p11 }
  0x7c   : > { %v1355_v0 = vld [vmem:[#allocation7] sm:$0xff]   ;;  %v1356_v1 = vld [vmem:[#allocation7 + $0x8] sm:$0xff]   ;;  %v1357_v2 = vld [vmem:[#allocation7 + $0x10] sm:$0xff]   ;;  %vm341_vm0 = vcmask 523264   ;;  %v1548_v8 = vmov 0.0   ;;  %vm1549_vm1 = vmmov 0   ;;  %v598_v30 = vlaneseq }
  0x7d   : > { %1522 = vsyncadd (%p2008_p13), [#allocation6], 4294966784  ;;  %1259 = vmatprep.subr.bf16.mxu1 %v1355_v0  ;;  %1247 = vmatprep.subr.bf16.mxu0 %v1355_v0  ;;  %v1359_v3 = vld [vmem:[%s248_s14] sm:$0xff]   ;;  %v1358_v5 = vld [vmem:[#allocation7 + $0x18] sm:$0xff]   ;;  %v1550_v25 = vmov 0   ;;  %s1208_s21 = sshll.u32 %s1601_s19, 1 }
  0x7e   : > { %1260 = vmatpush3.bf16.msra.mxu1 %v1355_v0  ;;  %1248 = vmatpush3.bf16.msra.mxu0 %v1355_v0  ;;  %v1361_v4 = vld [vmem:[%s1770_s8] sm:$0xff]   ;;  %v1360_v6 = vld [vmem:[%s248_s14 + $0x8] sm:$0xff]   ;;  %v1551_v32 = vmov 1966171168   ;;  %v1804_v36 = vshrl.u32 %v598_v30, 7  ;;  %p289_p3 = scmp.lt.s32.totalorder %s1208_s21, 3 }
  0x7f   : > { %1261 = vmatprep.subr.bf16.mxu1 %v1356_v1  ;;  %1249 = vmatprep.subr.bf16.mxu0 %v1356_v1  ;;  %v1362_v7 = vld [vmem:[%s1770_s8 + $0x8] sm:$0xff]   ;;  %v731_v33 = vunpack.c.l.s4 %v1551_v32  ;;  %vm945_vm2 = vcmask 130112   ;;  %vm1004_vm3 = vcmask 130048   ;;  %vm1043_vm4 = vcmask 1041409   ;;  %s1207_s28 = sshll.u32 %s1766_s24, 1  ;;  %s1230_s10 = sshll.u32 %s1601_s19, 5 }
  0x80   : > { %1267 = vmatprep.mubr.msk.bf16.mxu1 %vm341_vm0, %v1359_v3  ;;  %1255 = vmatprep.mubr.msk.bf16.mxu0 %vm341_vm0, %v1361_v4  ;;  %v1807_v39 = vsub.s32 0, %v1804_v36  ;;  %v1810_v40 = vsub.s32 1, %v1804_v36  ;;  %v1813_v41 = vsub.s32 2, %v1804_v36  ;;  %v1816_v42 = vsub.s32 3, %v1804_v36  ;;  %s2017_s21 = smov (!%p289_p3, %s1208_s21), 3  ;;  %s285_s26 = scalar_lea.vmem [#allocation8], %s1207_s28 }
  0x81   : > { %1354 = vset.pattern.permute.xlu1 %v1550_v25  ;;  %1353 = vset.pattern.permute.xlu0 %v1550_v25  ;;  %v732_v38 = vunpack.c.0.s8 %v731_v33  ;;  %v1819_v43 = vsub.s32 4, %v1804_v36  ;;  %v1822_v44 = vsub.s32 5, %v1804_v36  ;;  %v1825_v45 = vsub.s32 6, %v1804_v36  ;;  %s291_s7 = scalar_lea.vmem %s1982_s3, %s2017_s21  ;;  %s1077_s5 = sshll.u32 %s285_s26, 4  ;;  %s1928_s5 = int_to_ptr.vmem [resolvable:$true] %s1077_s5 }
  0x82   : > { %1262 = vmatpush3.bf16.msra.mxu1 %v1356_v1  ;;  %1250 = vmatpush3.bf16.msra.mxu0 %v1356_v1  ;;  %v1828_v46 = vsub.s32 7, %v1804_v36  ;;  %vm1046_vm5 = vcmask 123904   ;;  %s1933_s25 = scalar_lea.hbm %s1983_s4, %s1230_s10  ;;  %s1064_s29 = scalar_lea.sflag [#allocation4], %s1766_s24 }
  0x83   : > { %1263 = vmatprep.subr.bf16.mxu1 %v1357_v2  ;;  %1251 = vmatprep.subr.bf16.mxu0 %v1357_v2  ;;  %v1831_v48 = vsub.s32 %v732_v38, %v1804_v36  ;;  %s1467_s0 = scalar_lea.vmem %s1928_s5, 32  ;;  %s1552_s19 = smov [#allocation8]  }
  0x84   : > { %p1468_p7 = scmp.ne.s32.totalorder %s1928_s5, %s1467_s0  ;;  %s1471_s20 = sshll.u32 %s1552_s19, 4  ;;  %s1472_s20 = int_to_ptr.vmem [resolvable:$false] %s1471_s20 }
  0x85   : > { %s1473_s11 = scalar_lea.vmem %s1472_s20, 64  ;;  %p1474_p5 = scmp.lt.s32.totalorder %s1928_s5, %s1472_s20 }
  0x86   : > { %1264 = vmatpush3.bf16.msra.mxu1 %v1357_v2  ;;  %1252 = vmatpush3.bf16.msra.mxu0 %v1357_v2  ;;  %p1469_p9 = pnand %p1468_p7, %p1674_p12  ;;  %p1475_p2 = scmp.lt.s32.totalorder %s1473_s11, %s1467_s0 }
  0x87   : > { %1265 = vmatprep.subr.bf16.mxu1 %v1358_v5  ;;  %1253 = vmatprep.subr.bf16.mxu0 %v1358_v5 }
  0x88   : > { %p1470_p1 = pneg %p1469_p9  ;;  %p1476_p6 = por %p1475_p2, %p1474_p5 }
  0x8a   : > { %1266 = vmatpush3.bf16.msra.mxu1 %v1358_v5  ;;  %1254 = vmatpush3.bf16.msra.mxu0 %v1358_v5  ;;  %p1477_p8 = pnand %p1476_p6, %p1470_p1 }
  0x8b   : > { %1277 = vmatprep.subr.bf16.mxu1 %v1548_v8  ;;  %1271 = vmatprep.subr.bf16.mxu0 %v1548_v8 }
  0x8d   : > { %1268 = vmatmul.mubr.msk.bf16.vlgmr.msra.gmra.mrb[0].mxu1 %vm341_vm0, %v1360_v6  ;;  %1256 = vmatmul.mubr.msk.bf16.vlgmr.msra.gmra.mrb[0].mxu0 %vm341_vm0, %v1362_v7 }
  0x8e   : > { %1273 = vmatprep.mubr.msk.bf16.mxu0 %vm1549_vm1, %v1548_v8  ;;  %1279 = vmatprep.mubr.msk.bf16.mxu1 %vm1549_vm1, %v1548_v8 }
 0x160   : > { %v1269_v9 = vpop.f32.mrb[0].mxu1  ;;  %v1791_v10 = vpop.f32.mrb[0].mxu0 }
 0x161   : > { %v451_v11 = vpop.f32.mrb[1].mxu1  ;;  %v488_v12 = vmul.f32 %v1269_v9, %v1269_v9  ;;  %v1793_v13 = vpop.f32.mrb[1].mxu0 }
 0x162   : > { %v1270_v14 = vpop.f32.mrb[2].mxu1  ;;  %v486_v15 = vmul.f32 %v451_v11, %v451_v11  ;;  %v1795_v16 = vpop.f32.mrb[2].mxu0 }
 0x163   : > { %v509_v17 = vpack.c.bf16 %v1270_v14, %v1269_v9  ;;  %494 = vadd.xlane.f32.xlu1 %v488_v12  ;;  %v454_v18 = vpop.f32.mrb[3].mxu1  ;;  %v507_v19 = vpack.c.bf16 %v1795_v16, %v1791_v10  ;;  %v1799_v20 = vpop.f32.mrb[3].mxu0  ;;  %v489_v23 = vmul.f32 %v1270_v14, %v1270_v14 }
 0x164   : > { %v508_v21 = vpack.c.bf16 %v454_v18, %v451_v11  ;;  %490 = vadd.xlane.f32.xlu0 %v486_v15  ;;  %v506_v22 = vpack.c.bf16 %v1799_v20, %v1793_v13  ;;  %v487_v24 = vmul.f32 %v454_v18, %v454_v18 }
 0x165   : > { %1278 = vmatpush3.bf16.xpose.msra.mxu1 %v509_v17 }
 0x166   : > { %1272 = vmatpush3.bf16.xpose.msra.mxu0 %v508_v21 }
 0x167   : > { %496 = vadd.xlane.f32.xlu1 %v489_v23 }
 0x168   : > { %492 = vadd.xlane.f32.xlu0 %v487_v24 }
 0x16c   : > { %1280 = vmatmul.mubr.bf16.vlgmr.msra.gmra.mrb[4].mxu1 %v507_v19 }
 0x16d   : > { %1274 = vmatmul.mubr.bf16.vlgmr.msra.gmra.mrb[4].mxu0 %v506_v22 }
 0x1f0   : > { %v495_v26 = vpop.xlane.xlu1 %494 }
 0x1f1   : > { %v500_v27 = vmax.f32 %v495_v26, 1e-24  ;;  %v491_v28 = vpop.xlane.xlu0 %490 }
 0x1f2   : > { %v498_v29 = vmax.f32 %v491_v28, 1e-24 }
 0x1f3   : > { %1363 = vrsqrt.f32 %v500_v27 }
 0x1f4   : > { %1365 = vrsqrt.f32 %v498_v29  ;;  %v497_v34 = vpop.xlane.xlu1 %496 }
 0x1f5   : > { %v493_v31 = vpop.xlane.xlu0 %492  ;;  %v501_v37 = vmax.f32 %v497_v34, 1e-24 }
 0x1f6   : > { %v499_v35 = vmax.f32 %v493_v31, 1e-24 }
 0x1f8   : > { %1367 = vrsqrt.f32 %v499_v35 }
 0x1f9   : > { %1369 = vrsqrt.f32 %v501_v37 }
 0x1fd   : > { %v1364_v47 = vpop.eup %1363 }
 0x1fe   : > { %v1366_v49 = vpop.eup %1365  ;;  %v665_v50 = vrot.slane %v1364_v47, %v1807_v39  ;;  %v669_v51 = vrot.slane %v1364_v47, %v1810_v40  ;;  %v673_v52 = vrot.slane %v1364_v47, %v1813_v41  ;;  %v677_v53 = vrot.slane %v1364_v47, %v1816_v42 }
 0x1ff   : > { %v681_v54 = vrot.slane %v1364_v47, %v1819_v43  ;;  %v685_v55 = vrot.slane %v1364_v47, %v1822_v44  ;;  %v689_v56 = vrot.slane %v1364_v47, %v1825_v45  ;;  %v693_v57 = vrot.slane %v1364_v47, %v1828_v46 }
 0x200   : > { %v824_v58 = vcombine.low %v665_v50, %v669_v51  ;;  %v825_v59 = vcombine.low %v673_v52, %v677_v53  ;;  %v601_v60 = vrot.slane %v1366_v49, %v1807_v39  ;;  %v605_v61 = vrot.slane %v1366_v49, %v1810_v40 }
 0x201   : > { %v826_v62 = vcombine.low %v681_v54, %v685_v55  ;;  %v827_v63 = vcombine.low %v689_v56, %v693_v57  ;;  %v609_v0 = vrot.slane %v1366_v49, %v1813_v41  ;;  %v613_v1 = vrot.slane %v1366_v49, %v1816_v42 }
 0x202   : > { %v1368_v2 = vpop.eup %1367  ;;  %v834_v3 = vrot.slane %v824_v58, %v1831_v48  ;;  %v841_v4 = vrot.slane %v825_v59, %v1831_v48  ;;  %v617_v5 = vrot.slane %v1366_v49, %v1819_v43  ;;  %v621_v6 = vrot.slane %v1366_v49, %v1822_v44 }
 0x203   : > { %v848_v7 = vrot.slane %v826_v62, %v1831_v48  ;;  %v855_v8 = vrot.slane %v827_v63, %v1831_v48  ;;  %v625_v9 = vrot.slane %v1366_v49, %v1825_v45  ;;  %v629_v11 = vrot.slane %v1366_v49, %v1828_v46  ;;  %v1370_v27 = vpop.eup %1369 }
 0x204   : > { %v856_v12 = vcombine.low %v834_v3, %v841_v4  ;;  %v726_v14 = vcombine.low %v601_v60, %v605_v61  ;;  %v727_v15 = vcombine.low %v609_v0, %v613_v1  ;;  %v728_v17 = vcombine.low %v617_v5, %v621_v6 }
 0x205   : > { %v857_v18 = vcombine.low %v848_v7, %v855_v8  ;;  %v729_v19 = vcombine.low %v625_v9, %v629_v11  ;;  %v633_v21 = vrot.slane %v1368_v2, %v1807_v39  ;;  %v637_v22 = vrot.slane %v1368_v2, %v1810_v40 }
 0x206   : > { %v864_v23 = vrot.slane %v856_v12, %v1831_v48  ;;  %v736_v24 = vrot.slane %v726_v14, %v1831_v48  ;;  %v743_v25 = vrot.slane %v727_v15, %v1831_v48  ;;  %v750_v26 = vrot.slane %v728_v17, %v1831_v48 }
 0x207   : > { %v871_v28 = vrot.slane %v857_v18, %v1831_v48  ;;  %v757_v29 = vrot.slane %v729_v19, %v1831_v48  ;;  %v641_v31 = vrot.slane %v1368_v2, %v1813_v41  ;;  %v645_v32 = vrot.slane %v1368_v2, %v1816_v42 }
 0x208   : > { %v758_v33 = vcombine.low %v736_v24, %v743_v25  ;;  %v649_v34 = vrot.slane %v1368_v2, %v1819_v43  ;;  %v653_v35 = vrot.slane %v1368_v2, %v1822_v44  ;;  %v657_v37 = vrot.slane %v1368_v2, %v1825_v45 }
 0x209   : > { %v872_v38 = vcombine.low %v864_v23, %v871_v28  ;;  %v759_v47 = vcombine.low %v750_v26, %v757_v29  ;;  %v661_v49 = vrot.slane %v1368_v2, %v1828_v46  ;;  %v775_v50 = vcombine.low %v633_v21, %v637_v22 }
 0x20a   : > { %v766_v51 = vrot.slane %v758_v33, %v1831_v48  ;;  %v776_v52 = vcombine.low %v641_v31, %v645_v32  ;;  %v777_v53 = vcombine.low %v649_v34, %v653_v35  ;;  %v697_v54 = vrot.slane %v1370_v27, %v1807_v39 }
 0x20b   : > { %929 = vperm.xlu1 %1354, %v872_v38   ;;  %v773_v55 = vrot.slane %v759_v47, %v1831_v48  ;;  %v778_v56 = vcombine.low %v657_v37, %v661_v49  ;;  %v785_v57 = vrot.slane %v775_v50, %v1831_v48  ;;  %v701_v58 = vrot.slane %v1370_v27, %v1810_v40 }
 0x20c   : > { %v792_v59 = vrot.slane %v776_v52, %v1831_v48  ;;  %v799_v60 = vrot.slane %v777_v53, %v1831_v48  ;;  %v705_v61 = vrot.slane %v1370_v27, %v1813_v41  ;;  %v709_v62 = vrot.slane %v1370_v27, %v1816_v42 }
 0x20d   : > { %v774_v63 = vcombine.low %v766_v51, %v773_v55  ;;  %v806_v0 = vrot.slane %v778_v56, %v1831_v48  ;;  %v713_v1 = vrot.slane %v1370_v27, %v1819_v43  ;;  %v717_v2 = vrot.slane %v1370_v27, %v1822_v44  ;;  %v592_v51 = vld [vmem:[%s291_s7] sm:$0x1] }
 0x20e   : > { %v807_v3 = vcombine.low %v785_v57, %v792_v59  ;;  %v721_v4 = vrot.slane %v1370_v27, %v1825_v45  ;;  %v725_v5 = vrot.slane %v1370_v27, %v1828_v46  ;;  %v873_v6 = vcombine.low %v697_v54, %v701_v58  ;;  %v593_v58 = vld [vmem:[%s291_s7 + $0x1] sm:$0x1] }
 0x20f   : > { %923 = vperm.xlu0 %1353, %v774_v63   ;;  %v808_v7 = vcombine.low %v799_v60, %v806_v0  ;;  %v874_v8 = vcombine.low %v705_v61, %v709_v62  ;;  %v875_v9 = vcombine.low %v713_v1, %v717_v2  ;;  %v467_v21 = vmul.f32 %v1799_v20, %v1799_v20 }
 0x210   : > { %v815_v41 = vrot.slane %v807_v3, %v1831_v48  ;;  %v876_v42 = vcombine.low %v721_v4, %v725_v5  ;;  %v883_v11 = vrot.slane %v873_v6, %v1831_v48  ;;  %v466_v22 = vmul.f32 %v1793_v13, %v1793_v13 }
 0x211   : > { %v822_v12 = vrot.slane %v808_v7, %v1831_v48  ;;  %v890_v43 = vrot.slane %v874_v8, %v1831_v48  ;;  %v897_v44 = vrot.slane %v875_v9, %v1831_v48  ;;  %v468_v24 = vmul.f32 %v1791_v10, %v1791_v10 }
 0x212   : > { %v904_v45 = vrot.slane %v876_v42, %v1831_v48  ;;  %v469_v20 = vmul.f32 %v1795_v16, %v1795_v16  ;;  %v935_v33 = vand.u32 127, %v598_v30 }
 0x213   : > { %v823_v14 = vcombine.low %v815_v41, %v822_v12  ;;  %v905_v46 = vcombine.low %v883_v11, %v890_v43 }
 0x214   : > { %v906_v15 = vcombine.low %v897_v44, %v904_v45  ;;  %v940_v13 = vadd.s32 4294967288, %v935_v33  ;;  %v1900_v10 = vsub.s32 %v935_v33, %v1804_v36 }
 0x215   : > { %926 = vperm.xlu1 %1354, %v823_v14   ;;  %v913_v17 = vrot.slane %v905_v46, %v1831_v48 }
 0x216   : > { %v920_v18 = vrot.slane %v906_v15, %v1831_v48  ;;  %v1903_v35 = vsub.s32 %v940_v13, %v1804_v36 }
 0x218   : > { %v921_v19 = vcombine.low %v913_v17, %v920_v18 }
 0x21a   : > { %932 = vperm.xlu1 %1354, %v921_v19  }
 0x22e   : > { %472 = vadd.xlane.f32.xlu0 %v467_v21 }
 0x23e   : > { %470 = vadd.xlane.f32.xlu1 %v466_v22 }
 0x23f   : > { %v585_v23 = vpop.f32.mrb[4].mxu1 }
 0x240   : > { %v544_v25 = vpop.f32.mrb[4].mxu0  ;;  %v1281_v26 = vpop.f32.mrb[5].mxu1 }
 0x241   : > { %v1275_v27 = vpop.f32.mrb[5].mxu0  ;;  %v588_v28 = vpop.f32.mrb[6].mxu1 }
 0x242   : > { %474 = vadd.xlane.f32.xlu1 %v468_v24  ;;  %v547_v29 = vpop.f32.mrb[6].mxu0  ;;  %v1282_v31 = vpop.f32.mrb[7].mxu1 }
 0x243   : > { %v1276_v32 = vpop.f32.mrb[7].mxu0 }
 0x246   : > { %476 = vadd.xlane.f32.xlu1 %v469_v20 }
 0x28a   : > { %v930_v34 = vpop.permute.xlu1 %929 }
 0x28b   : > { %v950_v36 = vrot.slane %v930_v34, %v1900_v10 }
 0x28e   : > { %v924_v37 = vpop.permute.xlu0 %923 }
 0x28f   : > { %v939_v47 = vrot.slane %v924_v37, %v1900_v10 }
 0x294   : > { %v927_v38 = vpop.permute.xlu1 %926 }
 0x295   : > { %v944_v16 = vrot.slane %v927_v38, %v1903_v35 }
 0x297   : > { %v946_v30 = vsel %vm945_vm2, %v944_v16, %v939_v47 }
 0x298   : > { %v962_v49 = vrot.slane %v946_v30, %v1831_v48 }
 0x299   : > { %v933_v50 = vpop.permute.xlu1 %932 }
 0x29a   : > { %v954_v52 = vrot.slane %v933_v50, %v1903_v35  ;;  %v969_v53 = vrot.slane %v962_v49, %v1831_v48 }
 0x29c   : > { %v955_v54 = vsel %vm945_vm2, %v954_v52, %v950_v36  ;;  %v986_v55 = vmul.f32 %v969_v53, %v592_v51 }
 0x29d   : > { %v976_v56 = vrot.slane %v955_v54, %v1831_v48 }
 0x29e   : > { %v993_v57 = vrot.slane %v986_v55, %v1807_v39 }
 0x29f   : > { %v983_v59 = vrot.slane %v976_v56, %v1831_v48 }
 0x2a0   : > { %v1000_v60 = vmul.f32 %v993_v57, %v544_v25  ;;  %v1001_v62 = vmul.f32 %v993_v57, %v547_v29 }
 0x2a1   : > { %v987_v61 = vmul.f32 %v983_v59, %v593_v58 }
 0x2a2   : > { %v1005_v63 = vsel %vm1004_vm3, %v1000_v60, -inf  ;;  %v1008_v3 = vsel %vm1004_vm3, %v1001_v62, -inf }
 0x2a3   : > { %v997_v0 = vrot.slane %v987_v61, %v1807_v39  ;;  %1006 = vmax.xlane.f32.xlu1 %v1005_v63 }
 0x2a5   : > { %v1002_v1 = vmul.f32 %v997_v0, %v585_v23  ;;  %v1003_v2 = vmul.f32 %v997_v0, %v588_v28 }
 0x2a7   : > { %1009 = vmax.xlane.f32.xlu1 %v1008_v3  ;;  %v1011_v4 = vsel %vm1004_vm3, %v1002_v1, -inf  ;;  %v1014_v5 = vsel %vm1004_vm3, %v1003_v2, -inf }
 0x2a8   : > { %1012 = vmax.xlane.f32.xlu0 %v1011_v4 }
 0x2ab   : > { %1015 = vmax.xlane.f32.xlu1 %v1014_v5 }
 0x2bb   : > { %v473_v8 = vpop.xlane.xlu0 %472 }
 0x2bc   : > { %v479_v48 = vmax.f32 %v473_v8, 1e-24 }
 0x2be   : > { %1371 = vrsqrt.f32 %v479_v48 }
 0x2c8   : > { %v1372_v43 = vpop.eup %1371 }
 0x2cb   : > { %v471_v6 = vpop.xlane.xlu1 %470 }
 0x2cc   : > { %v478_v9 = vmax.f32 %v471_v6, 1e-24 }
 0x2ce   : > { %1373 = vrsqrt.f32 %v478_v9 }
 0x2cf   : > { %v475_v7 = vpop.xlane.xlu1 %474 }
 0x2d0   : > { %v480_v42 = vmax.f32 %v475_v7, 1e-24 }
 0x2d2   : > { %1375 = vrsqrt.f32 %v480_v42 }
 0x2d3   : > { %v477_v41 = vpop.xlane.xlu1 %476 }
 0x2d4   : > { %v481_v11 = vmax.f32 %v477_v41, 1e-24 }
 0x2d6   : > { %1377 = vrsqrt.f32 %v481_v11 }
 0x2d8   : > { %v1374_v45 = vpop.eup %1373 }
 0x2dc   : > { %v1376_v15 = vpop.eup %1375 }
 0x2e0   : > { %v1378_v19 = vpop.eup %1377 }
 0x330   : > { %v1007_v12 = vpop.xlane.xlu1 %1006 }
 0x331   : > { %v1017_v17 = vmul.f32 %v1374_v45, %v1007_v12 }
 0x333   : > { %v1028_v24 = vrot.slane %v1017_v17, %v1900_v10 }
 0x334   : > { %v1010_v44 = vpop.xlane.xlu1 %1009 }
 0x335   : > { %v1018_v14 = vmul.f32 %v1372_v43, %v1010_v44  ;;  %v1013_v46 = vpop.xlane.xlu0 %1012 }
 0x336   : > { %v1019_v18 = vmul.f32 %v1376_v15, %v1013_v46 }
 0x337   : > { %v1032_v22 = vrot.slane %v1018_v14, %v1903_v35 }
 0x338   : > { %v1016_v21 = vpop.xlane.xlu1 %1015  ;;  %v1037_v25 = vrot.slane %v1019_v18, %v1900_v10 }
 0x339   : > { %v1020_v23 = vmul.f32 %v1378_v19, %v1016_v21  ;;  %v1033_v27 = vsel %vm945_vm2, %v1032_v22, %v1028_v24 }
 0x33b   : > { %v1041_v26 = vrot.slane %v1020_v23, %v1903_v35 }
 0x33d   : > { %v1042_v28 = vsel %vm945_vm2, %v1041_v26, %v1037_v25 }
 0x33e   : > { %v1044_v29 = vsel %vm1043_vm4, %v1042_v28, %v1033_v27 }
 0x33f   : > { %v1047_v31 = vsel %vm1046_vm5, %v1044_v29, 0.0 }
 0x340   : > { %1048 = vadd.xlane.f32.xlu0 %v1047_v31 }
 0x3cd   : > { %v1049_v32 = vpop.xlane.xlu0 %1048 }
 0x3ce   : > { %v1054_v20 = vrot.slane %v1049_v32, %v1807_v39  ;;  %v1058_v33 = vrot.slane %v1049_v32, %v1810_v40 }
 0x3d0   : > { %1061 = vst [vmem:[%s285_s26] sm:$0x1] %v1054_v20  ;;  %1062 = vst [vmem:[%s285_s26 + $0x1] sm:$0x1] %v1058_v33 }
 0x3d1   : > { %1480 = shalt.err (!%p1477_p8)
}
 0x3d2   : > { %s1481_s8 = scalar_lea.hbm %s1933_s25, 32  ;;  %s1485_s14 = scalar_lea.hbm %s1983_s4, 64 }
 0x3d3   : > { %p1482_p10 = scmp.ne.s32.totalorder %s1933_s25, %s1481_s8  ;;  %p1486_p11 = scmp.lt.u32.totalorder %s1933_s25, %s1983_s4 }
 0x3d4   : > { %p1487_p13 = scmp.lt.u32.totalorder %s1485_s14, %s1481_s8  ;;  %p1489_p7 = scmp.lt.u32.totalorder %s1481_s8, %s1933_s25 }
 0x3d5   : > { %p1483_p0 = pnand %p1482_p10, %p1674_p12 }
 0x3d6   : > { %p1488_p3 = por %p1487_p13, %p1486_p11 }
 0x3d7   : > { %p1484_p4 = pneg %p1483_p0 }
 0x3d8   : > { %p1490_p9 = por %p1489_p7, %p1488_p3 }
 0x3da   : > { %p1491_p1 = pnand %p1490_p9, %p1484_p4 }
 0x3dc   : > { %1494 = shalt.err (!%p1491_p1)
}
 0x3dd   : > { %s1553_s13 = smov 16   ;;  %s1554_s7 = smov 1  }
 0x3de   : > { %1291 = dma.vmem_to_hbm [thread:$0]  (%p1674_p12), %s1928_s5, 32, %s1933_s25, %s1064_s29, %s1553_s13, %s1553_s13, %s1554_s7  }
 0x3df PF: > { %s1092_s28 = sand.u32 1, %s1529_s15   ;;  %p2009_p5 = scmp.ne.s32.totalorder %s1994_s22, 0 }
 0x3e0   : > { %p2010_p2 = scmp.ge.s32.totalorder %s1541_s18, 2  ;;  %s1093_s26 = scalar_lea.sflag [#allocation4], %s1092_s28 }
 0x3e2   : > { %p1305_p6 = pnand %p2010_p2, %p2009_p5 }
 0x3e4   : > { %1524 = dma.done.wait (!%p1305_p6), %s1093_s26, 32  }
 0x3e5   : > { %1526 = vsyncadd (!%p1305_p6), %s1093_s26, 4294967264  ;;  %s2011_s10 = sld [smem:[#allocation13_spill]]  ;;  %p20_p8 = scmp.ge.s32.totalorder %s1636_s27, 4  }
 0x3e6   : > { %s2012_s15 = smov %s1533_s16  ;;  %s2013_s16 = smov %s1537_s17 }
 0x3e7   : > { %s2015_s18 = smov %s1636_s27  ;;  %22 = sbr.rel (!%p20_p8) target bundleno = 10 (0xa), region = 101 }
 0x3eb   : > { %s2014_s17 = smov %s2011_s10 }
 0x3ee   :  { %1098 = vsyncpa [#allocation3], 1 }
 0x3ef   :  { %1100 = vsyncpa [#allocation3 + $0x1], 1 }
 0x3f0   :  { %1101 = vsyncpa [#allocation6], 1 }
 0x3f1   :  { %1103 = vsyncpa [#allocation6 + $0x1], 1 }
 0x3f2   :  { %1104 = vsyncpa [#allocation4], 1 }
 0x3f3   :  { %1106 = vsyncpa [#allocation4 + $0x1], 1 }

</bundles_post_ra>
